<compile_context>
chip_gen: v5e
topology: v5e:2x2
jax: 0.10.0
libtpu: 0.0.40
codegen_flags: <defaults>
</compile_context>

<pallas_src>
import functools

import jax
import jax.numpy as jnp
from jax import lax
from jax.experimental import pallas as pl
from jax.experimental.pallas import tpu as pltpu


def _round_up(x, m):
    return ((x + m - 1) // m) * m


def _round_down(x, m):
    return (x // m) * m


def _pow_p(xc, p_dyn, p_static):
    """x^p. Static integer p -> binary exponentiation on the VPU (no EUP pow)."""
    if p_static is not None:
        n = int(p_static)
        if n == 1:
            return xc
        result = None
        base = xc
        while n > 0:
            if n & 1:
                result = base if result is None else result * base
            n >>= 1
            if n:
                base = base * base
        return result
    return jnp.power(xc, p_dyn)


def _root_p(m, p_dyn, p_static):
    """m^(1/p). Static p in {1,2,4} avoids the EUP pow entirely."""
    if p_static is not None:
        n = int(p_static)
        if n == 1:
            return m
        if n == 2:
            return jnp.sqrt(m)
        if n == 4:
            return jnp.sqrt(jnp.sqrt(m))
        return jnp.power(m, 1.0 / float(n))
    return jnp.power(m, 1.0 / p_dyn)


# ----------------------------------------------------------------------------
# Kernels
# ----------------------------------------------------------------------------
def _gem_kernel_single(p_ref, x_ref, o_ref, *, eps, p_static, pow_dtype):
    # p_ref: SMEM (1,) f32; x_ref: VMEM (tile_rows, HW); o_ref: (tile_rows, 1)
    p = p_ref[0]
    xc = jnp.maximum(x_ref[...].astype(pow_dtype), eps)        # clamp(min=eps)
    xp = _pow_p(xc, p, p_static).astype(jnp.float32)           # .pow(p), f32 accum
    m = jnp.mean(xp, axis=-1, keepdims=True)                   # avg over spatial
    o_ref[...] = _root_p(m, p, p_static).astype(o_ref.dtype)   # .pow(1/p)


def _gem_kernel_packed(p_ref, x_ref, seg_ref, o_ref, *,
                       eps, p_static, pow_dtype, inv_hw, bf16_pow):
    # x_ref: (tile_rows, R*HW) packed rows (R logical rows per packed row).
    # seg_ref: (R*HW, R) 0/1 block-diagonal segment matrix (bf16), VMEM-resident.
    # Per-row spatial sums are MXU matmuls against seg (the MXU is otherwise
    # idle in this kernel); the output block is lane-dense (tile_rows, R).
    p = p_ref[0]
    xc = jnp.maximum(x_ref[...].astype(pow_dtype), eps)
    xp = _pow_p(xc, p, p_static)
    seg = seg_ref[...]
    if bf16_pow:
        # bf16 compute path (opt-in): one bf16 MXU pass, exact f32 accumulation.
        sums = jnp.dot(xp.astype(jnp.bfloat16), seg,
                       preferred_element_type=jnp.float32)
    else:
        # f32-accurate segmented reduce via an explicit hi/lo bf16 split: the
        # products against a 0/1 matrix are exact, so accuracy (~2^-18 rel) is
        # independent of the backend's f32-matmul precision default.
        xp32 = xp.astype(jnp.float32)
        hi = xp32.astype(jnp.bfloat16)
        lo = (xp32 - hi.astype(jnp.float32)).astype(jnp.bfloat16)
        sums = (jnp.dot(hi, seg, preferred_element_type=jnp.float32)
                + jnp.dot(lo, seg, preferred_element_type=jnp.float32))
    m = sums * inv_hw                                           # (tile_rows, R)
    o_ref[...] = _root_p(m, p, p_static).astype(o_ref.dtype)


def _gem_kernel_chunked(p_ref, x_ref, o_ref, acc_ref, *,
                        eps, p_static, pow_dtype, hw_total, hw_tile, need_mask):
    # Grid = (row_blocks, hw_blocks); hw axis is the ("arbitrary") reduction.
    j = pl.program_id(1)
    last = pl.num_programs(1) - 1

    @pl.when(j == 0)
    def _():
        acc_ref[...] = jnp.zeros_like(acc_ref)

    p = p_ref[0]
    xc = jnp.maximum(x_ref[...].astype(pow_dtype), eps)
    xp = _pow_p(xc, p, p_static).astype(jnp.float32)

    if need_mask:
        # Only the final HW block contains padded lanes; pay the mask only there.
        @pl.when(j != last)
        def _():
            acc_ref[...] += jnp.sum(xp, axis=-1, keepdims=True)

        @pl.when(j == last)
        def _():
            col = j * hw_tile + lax.broadcasted_iota(jnp.int32, xp.shape, 1)
            acc_ref[...] += jnp.sum(jnp.where(col < hw_total, xp, 0.0),
                                    axis=-1, keepdims=True)
    else:
        acc_ref[...] += jnp.sum(xp, axis=-1, keepdims=True)

    @pl.when(j == last)
    def _():
        m = acc_ref[...] * (1.0 / float(hw_total))
        o_ref[...] = _root_p(m, p, p_static).astype(o_ref.dtype)


# ----------------------------------------------------------------------------
# Wrapper
# ----------------------------------------------------------------------------
def _choose_pack_rows(NC, HW, *, r_max=32, seg_budget_bytes=1 << 20):
    """Largest divisor R of NC (2 <= R <= r_max) whose bf16 segment matrix fits."""
    for r in range(min(r_max, NC), 1, -1):
        if NC % r == 0 and r * r * HW * 2 <= seg_budget_bytes:
            return r
    return 1


def gem_pallas(x, p=None, eps=1e-6, *,
               p_static=None,
               pow_dtype=None,
               core_parallel=False,
               vmem_buffer_bytes=12 * 1024 * 1024,   # per double-buffered input buffer
               min_grid_steps=8,
               force_hw_chunking=False,
               hw_pack_max=1024,
               tile_rows=None, hw_tile=None):
    """GeM pooling. x: (N, C, H, W); p: (1,) exponent (or p_static int).

    Matches F.avg_pool2d(x.clamp(min=eps).pow(p), (H, W)).pow(1/p) -> (N, C, 1, 1).

    * p_static (positive int) takes a VPU-only fast path; if given, any runtime
      p is ignored (the kernel uses p_static exclusively).
    * pow_dtype: dtype used for clamp/pow. Default f32 (required on v5e, which
      has no bf16 VPU/EUP). On v6e/v7x with bf16 inputs, jnp.bfloat16 doubles
      the EUP pow rate for the dynamic-p path; accumulation stays in f32.
    * core_parallel: set True on v7x so the row grid axis is CORE_PARALLEL and
      shards across the chip's two TensorCores; leave False on v5e/v6e.
    """
    N, C, H, W = x.shape
    NC, HW = N * C, H * W

    if p_static is not None:
        assert float(p_static) == int(p_static) and int(p_static) >= 1, \
            "p_static fast path requires a positive integer exponent"
        # p_static overrides any runtime p (the kernel never reads it).
        p_arr = jnp.full((1,), float(p_static), dtype=jnp.float32)
    else:
        assert p is not None, "need p or p_static"
        p_arr = jnp.asarray(p, dtype=jnp.float32).reshape((1,))

    if pow_dtype is None:
        pow_dtype = jnp.float32
    pow_dtype = jnp.dtype(pow_dtype)
    bf16_pow = pow_dtype == jnp.dtype(jnp.bfloat16)

    itemsize = jnp.dtype(x.dtype).itemsize
    packing = max(1, 4 // itemsize)
    sublane = 8 * packing          # 8 for f32, 16 for bf16, ...
    lane = 128

    hw_padded = _round_up(HW, lane)
    row_bytes = hw_padded * itemsize            # VMEM bytes per (unpacked) row

    # Chunk the HW axis only if even a minimal row block cannot fit the
    # per-buffer VMEM budget (very large spatial maps).
    use_chunking = force_hw_chunking or (sublane * row_bytes > vmem_buffer_bytes)

    # Packed / MXU segmented-reduce path for small, lane-misaligned spatial maps
    # (the typical GeM case: 7x7, 10x10, 14x14 ...).
    pack_r = 1
    if (not use_chunking) and (HW % lane != 0) and HW <= hw_pack_max:
        pack_r = _choose_pack_rows(NC, HW)

    # Row axis sharding: CORE_PARALLEL only helps on multi-TC chips (v7x).
    row_sem = pltpu.CORE_PARALLEL if core_parallel else pltpu.PARALLEL

    # Advisory cost: we read the whole feature map even though the output is tiny.
    transcendentals = 0 if p_static is not None else 2 * NC * HW + 2 * NC
    base_flops = 3 * NC * HW
    bytes_acc = NC * HW * itemsize + NC * itemsize

    smem_spec = pl.BlockSpec(memory_space=pltpu.MemorySpace.SMEM)
    # 32 MiB scoped VMEM fits all generations (v7x only has 64 MiB total);
    # do not retune buffers above ~48-56 MiB total for v7x.
    cparams = functools.partial(
        pltpu.CompilerParams, vmem_limit_bytes=32 * 1024 * 1024)

    # ---------------- packed (MXU segmented-reduce) path ----------------
    if (not use_chunking) and pack_r >= 2:
        R = pack_r
        NCp = NC // R
        RHW = R * HW
        x_packed = x.reshape(NCp, RHW)       # free: contiguous reshape
        # 0/1 block-diagonal segment matrix, exact in bf16.
        rows_idx = jnp.arange(RHW, dtype=jnp.int32)[:, None] // HW
        cols_idx = jnp.arange(R, dtype=jnp.int32)[None, :]
        seg = (rows_idx == cols_idx).astype(jnp.bfloat16)        # (RHW, R)

        row_bytes_p = _round_up(RHW, lane) * itemsize
        if tile_rows is None:
            if NCp < sublane:
                tile_rows = NCp                                   # == full dim
            else:
                max_rows_vmem = _round_down(vmem_buffer_bytes // row_bytes_p, sublane)
                rows_for_steps = _round_up(pl.cdiv(NCp, min_grid_steps), sublane)
                tile_rows = max(sublane, min(max_rows_vmem, rows_for_steps))
                tile_rows = min(tile_rows, _round_up(NCp, sublane))

        grid = (pl.cdiv(NCp, tile_rows),)
        cost = pl.CostEstimate(
            flops=base_flops + 4 * NC * HW * R,
            transcendentals=transcendentals,
            bytes_accessed=bytes_acc + RHW * R * 2,
        )
        out = pl.pallas_call(
            functools.partial(_gem_kernel_packed, eps=eps, p_static=p_static,
                              pow_dtype=pow_dtype, inv_hw=1.0 / float(HW),
                              bf16_pow=bf16_pow),
            out_shape=jax.ShapeDtypeStruct((NCp, R), x.dtype),
            grid=grid,
            in_specs=[
                smem_spec,                                              # p
                pl.BlockSpec((tile_rows, RHW), lambda i: (i, 0)),       # packed x
                pl.BlockSpec((RHW, R), lambda i: (0, 0)),               # seg (resident)
            ],
            out_specs=pl.BlockSpec((tile_rows, R), lambda i: (i, 0)),   # lane-dense
            compiler_params=cparams(dimension_semantics=(row_sem,)),
            cost_estimate=cost,
        )(p_arr, x_packed, seg)
        # out[i, r] is the GeM value of flat row i*R + r -> row-major reshape works.
        return out.reshape(N, C, 1, 1)

    # ---------------- single-pass path (HW fits VMEM in one lane-row) -------
    if not use_chunking:
        if tile_rows is None:
            if NC < sublane:
                tile_rows = NC                      # block == full array dim
            else:
                max_rows_vmem = _round_down(vmem_buffer_bytes // row_bytes, sublane)
                rows_for_steps = _round_up(pl.cdiv(NC, min_grid_steps), sublane)
                tile_rows = max(sublane, min(max_rows_vmem, rows_for_steps))
                tile_rows = min(tile_rows, _round_up(NC, sublane))

        grid = (pl.cdiv(NC, tile_rows),)
        cost = pl.CostEstimate(flops=base_flops, transcendentals=transcendentals,
                               bytes_accessed=bytes_acc)
        out = pl.pallas_call(
            functools.partial(_gem_kernel_single, eps=eps, p_static=p_static,
                              pow_dtype=pow_dtype),
            out_shape=jax.ShapeDtypeStruct((NC, 1), x.dtype),
            grid=grid,
            in_specs=[
                smem_spec,                                            # p scalar
                pl.BlockSpec((tile_rows, HW), lambda i: (i, 0)),      # x rows
            ],
            out_specs=pl.BlockSpec((tile_rows, 1), lambda i: (i, 0)),
            compiler_params=cparams(dimension_semantics=(row_sem,)),
            cost_estimate=cost,
        )(p_arr, x.reshape(NC, HW))
        return out.reshape(N, C, 1, 1)

    # ---------------- chunked path: grid (row_blocks, hw_blocks) ------------
    if tile_rows is None:
        if NC < sublane:
            tile_rows = NC
        else:
            # ~256 rows amortizes per-(i) writeback while keeping hw_tile long.
            tile_rows = max(sublane, min(_round_up(NC, sublane), 256))
    if hw_tile is None:
        hw_tile = _round_down(vmem_buffer_bytes // (max(tile_rows, 1) * itemsize),
                              lane)
        hw_tile = max(lane, min(hw_tile, _round_up(HW, lane)))
    assert hw_tile % lane == 0, "hw_tile must be a multiple of 128"
    need_mask = (HW % hw_tile) != 0

    grid = (pl.cdiv(NC, tile_rows), pl.cdiv(HW, hw_tile))
    cost = pl.CostEstimate(flops=base_flops, transcendentals=transcendentals,
                           bytes_accessed=bytes_acc)
    out = pl.pallas_call(
        functools.partial(_gem_kernel_chunked, eps=eps, p_static=p_static,
                          pow_dtype=pow_dtype, hw_total=HW, hw_tile=hw_tile,
                          need_mask=need_mask),
        out_shape=jax.ShapeDtypeStruct((NC, 1), x.dtype),
        grid=grid,
        in_specs=[
            smem_spec,                                                 # p
            pl.BlockSpec((tile_rows, hw_tile), lambda i, j: (i, j)),   # x
        ],
        out_specs=pl.BlockSpec((tile_rows, 1), lambda i, j: (i, 0)),
        scratch_shapes=[pltpu.VMEM((tile_rows, 1), jnp.float32)],
        compiler_params=cparams(dimension_semantics=(row_sem, pltpu.ARBITRARY)),
        cost_estimate=cost,
    )(p_arr, x.reshape(NC, HW))
    return out.reshape(N, C, 1, 1)


def gem_reference(x, p, eps=1e-6):
    xc = jnp.maximum(x.astype(jnp.float32), eps)
    m = jnp.mean(jnp.power(xc, p[0]), axis=(-2, -1), keepdims=True)
    return jnp.power(m, 1.0 / p[0]).astype(x.dtype)


if __name__ == "__main__":
    key = jax.random.PRNGKey(0)
    eps = 1e-6
    # Deterministic parameter init: p = ones(1) * 3 (as in GeM.__init__).
    p3 = jnp.ones((1,), dtype=jnp.float32) * 3.0
    p4 = jnp.full((1,), 4.0, dtype=jnp.float32)

    # 1) lane-aligned HW (16x16=256): single-pass path, dynamic trainable p.
    x = jax.random.uniform(key, (2, 4, 16, 16), dtype=jnp.float32)
    ref = gem_reference(x, p3, eps=eps)
    out = gem_pallas(x, p3, eps=eps)
    jax.block_until_ready(out)
    assert out.shape == (2, 4, 1, 1)
    assert jnp.allclose(out, ref, rtol=1e-5, atol=1e-5)

    # 2) static-p fast paths (binary exponentiation + sqrt roots, no EUP pow).
    out_s3 = gem_pallas(x, eps=eps, p_static=3)
    jax.block_until_ready(out_s3)
    assert jnp.allclose(out_s3, ref, rtol=1e-5, atol=1e-5)
    out_s4 = gem_pallas(x, eps=eps, p_static=4)
    jax.block_until_ready(out_s4)
    assert jnp.allclose(out_s4, gem_reference(x, p4, eps=eps), rtol=1e-5, atol=1e-5)

    # 3) packed MXU segmented-reduce path: typical GeM maps with HW % 128 != 0.
    for shape in [(2, 4, 7, 7), (2, 64, 7, 7), (2, 3, 10, 10), (2, 16, 14, 14)]:
        xs = jax.random.uniform(jax.random.PRNGKey(1), shape, dtype=jnp.float32)
        rs = gem_reference(xs, p3, eps=eps)
        os_dyn = gem_pallas(xs, p3, eps=eps)
        jax.block_until_ready(os_dyn)
        assert os_dyn.shape == shape[:2] + (1, 1)
        assert jnp.allclose(os_dyn, rs, rtol=1e-5, atol=1e-5), shape
        os_sta = gem_pallas(xs, eps=eps, p_static=3)
        jax.block_until_ready(os_sta)
        assert jnp.allclose(os_sta, rs, rtol=1e-5, atol=1e-5), shape

    # 4) single-pass path with multiple grid steps and a partial last row block
    #    (NC=72 not a multiple of tile_rows): padded rows are computed & discarded.
    x_p = jax.random.uniform(jax.random.PRNGKey(2), (2, 36, 16, 16), jnp.float32)
    out_p = gem_pallas(x_p, p3, eps=eps)
    jax.block_until_ready(out_p)
    assert jnp.allclose(out_p, gem_reference(x_p, p3, eps=eps), rtol=1e-5, atol=1e-5)

    # 5) chunked accumulation path (used automatically for huge spatial maps):
    #    multi-block HW axis without masking.
    out_c = gem_pallas(x, p3, eps=eps, force_hw_chunking=True, hw_tile=128)
    jax.block_until_ready(out_c)
    assert jnp.allclose(out_c, ref, rtol=1e-5, atol=1e-5)

    # 6) chunked path with lane masking on the final block only (HW=100).
    x_m = jax.random.uniform(jax.random.PRNGKey(3), (2, 3, 10, 10), jnp.float32)
    out_m = gem_pallas(x_m, p3, eps=eps, force_hw_chunking=True)
    jax.block_until_ready(out_m)
    assert jnp.allclose(out_m, gem_reference(x_m, p3, eps=eps), rtol=1e-5, atol=1e-5)

    print("KERNEL_OK")
</pallas_src>

<mosaic_0001>
module attributes {stable_mosaic.version = 11 : i64} {
  func.func @_gem_kernel_single(%arg0: i32, %arg1: memref<1xf32, #tpu.memory_space<smem>>, %arg2: memref<8x256xf32, #tpu.memory_space<vmem>>, %arg3: memref<8x1xf32, #tpu.memory_space<vmem>>) attributes {dimension_semantics = [#tpu.dimension_semantics<parallel>], iteration_bounds = array<i64: 1>, scalar_prefetch = 0 : i64, scratch_operands = 0 : i64, tpu.core_type = #tpu.core_type<tc>, window_params = [{transform_indices = @transform_0, window_bounds = array<i64: 1>}, {transform_indices = @transform_1, window_bounds = array<i64: 8, 256>}, {transform_indices = @transform_2, window_bounds = array<i64: 8, 1>}]} {
    %c0 = arith.constant 0 : index
    %0 = memref.load %arg1[%c0] : memref<1xf32, #tpu.memory_space<smem>>
    %c0_0 = arith.constant 0 : index
    %c0_1 = arith.constant 0 : index
    %1 = vector.load %arg2[%c0_0, %c0_1] : memref<8x256xf32, #tpu.memory_space<vmem>>, vector<8x256xf32>
    %cst = arith.constant 9.99999997E-7 : f32
    %2 = vector.broadcast %cst : f32 to vector<8x256xf32>
    %3 = arith.maximumf %1, %2 : vector<8x256xf32>
    %4 = vector.broadcast %0 : f32 to vector<8x256xf32>
    %5 = math.powf %3, %4 : vector<8x256xf32>
    %cst_2 = arith.constant dense<0.000000e+00> : vector<8xf32>
    %6 = vector.multi_reduction <add>, %5, %cst_2 [1] : vector<8x256xf32> to vector<8xf32>
    %7 = vector.shape_cast %6 : vector<8xf32> to vector<8x1xf32>
    %cst_3 = arith.constant 2.560000e+02 : f32
    %8 = vector.broadcast %cst_3 : f32 to vector<8x1xf32>
    %9 = arith.divf %7, %8 : vector<8x1xf32>
    %cst_4 = arith.constant 1.000000e+00 : f32
    %10 = arith.divf %cst_4, %0 : f32
    %11 = vector.broadcast %10 : f32 to vector<8x1xf32>
    %12 = math.powf %9, %11 : vector<8x1xf32>
    %c0_5 = arith.constant 0 : index
    %c0_6 = arith.constant 0 : index
    %13 = vector.load %arg3[%c0_5, %c0_6] : memref<8x1xf32, #tpu.memory_space<vmem>>, vector<8x1xf32>
    tpu.vector_store %arg3[%c0_5, %c0_6], %12 {strides = array<i32>} : memref<8x1xf32, #tpu.memory_space<vmem>>, vector<8x1xf32>,
    return
  }
  func.func @transform_0(%arg0: i32) -> i32 {
    %c0_i32 = arith.constant 0 : i32
    %c0_i32_0 = arith.constant 0 : i32
    return %c0_i32 : i32
  }
  func.func @transform_1(%arg0: i32) -> (i32, i32) {
    %c0_i32 = arith.constant 0 : i32
    %c0_i32_0 = arith.constant 0 : i32
    return %arg0, %c0_i32 : i32, i32
  }
  func.func @transform_2(%arg0: i32) -> (i32, i32) {
    %c0_i32 = arith.constant 0 : i32
    %c0_i32_0 = arith.constant 0 : i32
    return %arg0, %c0_i32 : i32, i32
  }
}

</mosaic_0001>

<bundles_post_ra>
// kernel: tpu_custom_call.1
= control target key start
LH: loop header
LB: loop body
LE: loop exit
PB: predicated region body
PF: predicated region fallthrough
CT: control target
= control target key end

     0   :  { %8 = vsyncpa [#allocation4], 0  ;;  %s415_s12 = smov [#allocation3]   ;;  %s735_s0 = inlined_call_operand.<no memory space> [shape: f32[1], index: 0, kind: input, shape index: {}]   ;;  %s736_s1 = inlined_call_operand.hbm [shape: f32[8,256], index: 1, kind: input, shape index: {}]   ;;  %s737_s2 = inlined_call_operand.vmem [shape: f32[8,1], index: 2, kind: output, shape index: {}]  }
   0x1   :  { %s16_s11 = sshll.u32 %s736_s1, 4  ;;  %s18_s13 = sshll.u32 %s415_s12, 4  ;;  %s17_s11 = int_to_ptr.hbm [resolvable:$true] %s16_s11  ;;  %s19_s13 = int_to_ptr.vmem [resolvable:$true] %s18_s13 }
   0x2   :  { %21 = dma.hbm_to_vmem [thread:$0]  %s17_s11, 256, %s19_s13, [#allocation4]  }
   0x3   :  { %413 = dma.done.wait [#allocation4], 256  }
   0x4   :  { %414 = vsyncadd [#allocation4], 4294967040  ;;  %v27_v0 = vld [vmem:[#allocation3] sm:$0xff]  ;;  %v28_v1 = vld [vmem:[#allocation3 + $0x8] sm:$0xff]  ;;  %v466_v29 = vstv %s735_s0 }
   0x5   :  { %v437_v2 = vmax.f32 %v27_v0, 1e-06  ;;  %v439_v3 = vmax.f32 %v28_v1, 1e-06  ;;  %v469_v38 = vand.u32 2147483647, %v466_v29  ;;  %v123_v49 = vceil.f32 %v466_v29 }
   0x6   :  { %v124_v50 = vfloor.f32 %v466_v29  ;;  %vm122_vm2 = vcmp.lt.s32.totalorder %v466_v29, 0  ;;  %379 = vrcp.f32 %v466_v29  ;;  %vm121_vm10 = vcmp.lt.f32.partialorder %v466_v29, 0 }
   0x7   :  { %v442_v4 = vand.u32 2147483647, %v437_v2  ;;  %v445_v5 = vand.u32 2147483647, %v439_v3  ;;  %v130_v51 = vfloor.f32 %v469_v38  ;;  %vm738_vm3 = vcmp.eq.f32.partialorder %v469_v38, 2139095040 }
   0x8   :  { %v125_v60 = vsel %vm122_vm2, %v123_v49, %v124_v50  ;;  %vm138_vm11 = vcmp.eq.f32.partialorder %v437_v2, 0 }
   0x9   :  { %v76_v6 = vand.u32 8388607, %v442_v4  ;;  %v177_v7 = vand.u32 8388607, %v445_v5  ;;  %v72_v18 = vand.u32 2139095040, %v442_v4  ;;  %v173_v24 = vand.u32 2139095040, %v445_v5 }
   0xa   :  { %v131_v62 = vcvt.f32.s32 %v130_v51  ;;  %vm126_vm4 = vcmp.ne.f32.partialorder %v466_v29, %v125_v60  ;;  %vm110_vm5 = vweird.f32 %v442_v4  ;;  %vm109_vm6 = vcmp.lt.f32.partialorder %v442_v4, 0.0 }
   0xb   :  { %v77_v8 = vor.u32 8388608, %v76_v6  ;;  %v178_v9 = vor.u32 8388608, %v177_v7  ;;  %v73_v23 = vshrl.u32 %v72_v18, 23  ;;  %v174_v33 = vshrl.u32 %v173_v24, 23  ;;  %vm485_vm7 = vmor %vm126_vm4, %vm738_vm3 }
   0xc   :  { %vm108_vm8 = vcmp.eq.f32.partialorder %v442_v4, 0.0  ;;  %vm107_vm9 = vcmp.eq.f32.partialorder %v442_v4, 1.0  ;;  %vm134_vm13 = vmneg %vm485_vm7  ;;  %vm141_vm14 = vcmp.gt.f32.partialorder %v442_v4, 1065353216  ;;  %vm211_vm15 = vweird.f32 %v445_v5  ;;  %v380_v24 = vpop.eup %379 }
   0xd   :  { %v79_v10 = vand.u32 8388607, %v77_v8  ;;  %v180_v11 = vand.u32 8388607, %v178_v9  ;;  %v169_v32 = vadd.s32 4294967169, %v73_v23  ;;  %v270_v44 = vadd.s32 4294967169, %v174_v33 }
   0xe   :  { %vm210_vm2 = vcmp.lt.f32.partialorder %v445_v5, 0.0  ;;  %vm128_vm4 = vcmp.lt.f32.partialorder %v469_v38, 1266679808  ;;  %vm52_vm3 = vweird.f32 %v380_v24 }
   0xf   :  { %v80_v12 = vor.u32 1065353216, %v79_v10  ;;  %v449_v13 = vor.u32 1065353216, %v180_v11  ;;  %v84_v43 = vadd.s32 1, %v169_v32  ;;  %v185_v61 = vadd.s32 1, %v270_v44 }
  0x10   :  { %v132_v11 = vand.u32 1, %v131_v62 }
  0x11   :  { %vm81_vm0 = vcmp.ge.f32.partialorder %v80_v12, 1.4142135  ;;  %v82_v14 = vmul.f32 0.5, %v80_v12  ;;  %v183_v15 = vmul.f32 0.5, %v449_v13  ;;  %vm182_vm1 = vcmp.ge.f32.partialorder %v449_v13, 1.4142135 }
  0x12   :  { %v85_v56 = vsel %vm81_vm0, %v84_v43, %v169_v32  ;;  %v186_v10 = vsel %vm182_vm1, %v185_v61, %v270_v44  ;;  %vm133_vm12 = vcmp.eq.s32.totalorder %v132_v11, 1 }
  0x13   :  { %v83_v16 = vsel %vm81_vm0, %v82_v14, %v80_v12  ;;  %v184_v20 = vsel %vm182_vm1, %v183_v15, %v449_v13  ;;  %v105_v6 = vcvt.s32.f32 %v85_v56  ;;  %v206_v13 = vcvt.s32.f32 %v186_v10  ;;  %vm505_vm1 = vmand %vm121_vm10, %vm138_vm11 }
  0x14   :  { %v170_v17 = vadd.f32 -1.0, %v83_v16  ;;  %v459_v25 = vadd.f32 -1.0, %v184_v20  ;;  %vm739_vm0 = vcmp.lt.f32.partialorder %v437_v2, 0 }
  0x16   :  { %v87_v19 = vmul.f32 %v170_v17, %v170_v17  ;;  %v188_v28 = vmul.f32 %v459_v25, %v459_v25 }
  0x18   :  { %v88_v21 = vmul.f32 0.12621109, %v87_v19  ;;  %v90_v22 = vmul.f32 -0.20706727, %v87_v19  ;;  %v189_v34 = vmul.f32 0.12621109, %v188_v28 }
  0x19   :  { %v191_v35 = vmul.f32 -0.20706727, %v188_v28 }
  0x1a   :  { %v89_v26 = vadd.f32 0.21545328, %v88_v21  ;;  %v91_v27 = vadd.f32 -0.23896284, %v90_v22  ;;  %v190_v39 = vadd.f32 0.21545328, %v189_v34 }
  0x1b   :  { %v192_v40 = vadd.f32 -0.23896284, %v191_v35  ;;  %v57_v34 = vand.u32 2147483648, %v466_v29 }
  0x1c   :  { %v92_v30 = vmul.f32 %v89_v26, %v87_v19  ;;  %v94_v31 = vmul.f32 %v91_v27, %v87_v19  ;;  %v193_v45 = vmul.f32 %v190_v39, %v188_v28  ;;  %v416_v27 = vmov 2139095040  }
  0x1d   :  { %v195_v46 = vmul.f32 %v192_v40, %v188_v28 }
  0x1e   :  { %v93_v36 = vadd.f32 0.28795174, %v92_v30  ;;  %v95_v37 = vadd.f32 -0.3607037, %v94_v31  ;;  %v194_v52 = vadd.f32 0.28795174, %v193_v45  ;;  %v47_v31 = vmul.f32 %v380_v24, %v466_v29 }
  0x1f   :  { %v196_v53 = vadd.f32 -0.3607037, %v195_v46  ;;  %v58_v45 = vor.u32 1.1754944e-38, %v57_v34  ;;  %v417_v46 = vmov 0  }
  0x20   :  { %v96_v41 = vmul.f32 %v93_v36, %v87_v19  ;;  %v98_v42 = vmul.f32 %v95_v37, %v87_v19  ;;  %v197_v57 = vmul.f32 %v194_v52, %v188_v28  ;;  %v48_v37 = vsub.f32 1.0, %v47_v31 }
  0x21   :  { %v199_v58 = vmul.f32 %v196_v53, %v188_v28 }
  0x22   :  { %v97_v47 = vadd.f32 0.48090908, %v96_v41  ;;  %v99_v48 = vadd.f32 -0.72134733, %v98_v42  ;;  %v198_v63 = vadd.f32 0.48090908, %v197_v57  ;;  %v49_v43 = vmul.f32 %v380_v24, %v48_v37 }
  0x23   :  { %v200_v0 = vadd.f32 -0.72134733, %v199_v58 }
  0x24   :  { %v100_v54 = vmul.f32 %v97_v47, %v87_v19  ;;  %v102_v55 = vmul.f32 %v170_v17, %v99_v48  ;;  %v201_v7 = vmul.f32 %v198_v63, %v188_v28  ;;  %v522_v28 = vsel %vm121_vm10, 0, %v416_v27 }
  0x25   :  { %v203_v8 = vmul.f32 %v459_v25, %v200_v0  ;;  %v158_v40 = vxor.u32 2147483648, %v522_v28  ;;  %v145_v47 = vsel %vm121_vm10, 2139095040, %v417_v46  ;;  %v50_v49 = vadd.f32 %v380_v24, %v49_v43 }
  0x26   :  { %v101_v59 = vadd.f32 1.442695, %v100_v54  ;;  %v202_v12 = vadd.f32 1.442695, %v201_v7 }
  0x28   :  { %v103_v1 = vadd.f32 %v102_v55, %v101_v59  ;;  %v204_v16 = vadd.f32 %v203_v8, %v202_v12 }
  0x2a   :  { %v104_v9 = vmul.f32 %v170_v17, %v103_v1  ;;  %v205_v19 = vmul.f32 %v459_v25, %v204_v16 }
  0x2c   :  { %v106_v14 = vadd.f32 %v105_v6, %v104_v9  ;;  %v207_v23 = vadd.f32 %v206_v13, %v205_v19 }
  0x2e   :  { %v111_v17 = vsel %vm110_vm5, %v442_v4, %v106_v14  ;;  %vm135_vm5 = vmand %vm133_vm12, %vm134_vm13  ;;  %v212_v30 = vsel %vm211_vm15, %v445_v5, %v207_v23  ;;  %vm740_vm13 = vcmp.eq.f32.partialorder %v439_v3, 0  ;;  %vm51_vm15 = vweird.f32 %v466_v29 }
  0x2f   :  { %v112_v18 = vsel %vm109_vm6, nan, %v111_v17  ;;  %vm209_vm6 = vcmp.eq.f32.partialorder %v445_v5, 0.0  ;;  %vm531_vm12 = vmand %vm739_vm0, %vm485_vm7  ;;  %v213_v33 = vsel %vm210_vm2, nan, %v212_v30  ;;  %vm242_vm2 = vcmp.gt.f32.partialorder %v445_v5, 1065353216 }
  0x30   :  { %v113_v20 = vsel %vm108_vm8, -inf, %v112_v18  ;;  %vm515_vm8 = vmxor %vm121_vm10, %vm141_vm14  ;;  %v214_v36 = vsel %vm209_vm6, -inf, %v213_v33 }
  0x31   :  { %v114_v21 = vsel %vm107_vm9, 0.0, %v113_v20  ;;  %vm208_vm9 = vcmp.eq.f32.partialorder %v445_v5, 1.0  ;;  %vm537_vm14 = vmand %vm128_vm4, %vm135_vm5  ;;  %vm140_vm5 = vcmp.lt.s32.totalorder %v437_v2, 0  ;;  %v418_v20 = vmov 256.0  }
  0x32   :  { %v115_v25 = vmul.f32 %v114_v21, %v466_v29  ;;  %vm152_vm0 = vmor %vm505_vm1, %vm515_vm8  ;;  %v215_v39 = vsel %vm208_vm9, 0.0, %v214_v36  ;;  %v159_v54 = vsel %vm537_vm14, %v158_v40, %v522_v28  ;;  %vm163_vm1 = vcmp.ne.f32.partialorder %v466_v29, %v466_v29 }
  0x33   :  { %v216_v41 = vmul.f32 %v215_v39, %v466_v29  ;;  %vm553_vm4 = vmand %vm121_vm10, %vm740_vm13  ;;  %vm56_vm13 = vcmp.eq.f32.partialorder %v469_v38, 8.507059e+37  ;;  %v153_v51 = vsel %vm152_vm0, 2139095040, %v417_v46  ;;  %vm162_vm0 = vcmp.ne.f32.partialorder %v437_v2, %v437_v2 }
  0x34   :  { %381 = vpow2.f32 %v115_v25  ;;  %vm558_vm6 = vmor %vm51_vm15, %vm52_vm3  ;;  %vm154_vm3 = vcmp.eq.f32.partialorder %v437_v2, 3212836864  ;;  %vm238_vm15 = vcmp.lt.f32.partialorder %v439_v3, 0 }
  0x35   :  { %383 = vpow2.f32 %v216_v41  ;;  %vm567_vm9 = vmxor %vm121_vm10, %vm242_vm2  ;;  %v54_v55 = vsel %vm558_vm6, %v380_v24, %v50_v49  ;;  %vm139_vm2 = vcmp.eq.f32.partialorder %v437_v2, 1065353216  ;;  %v155_v59 = vsel %vm154_vm3, 1065353216, %v153_v51 }
  0x36   :  { %vm584_vm10 = vmand %vm140_vm5, %vm537_vm14  ;;  %v59_v57 = vsel %vm56_vm13, %v58_v45, %v54_v55  ;;  %vm142_vm5 = vcmp.eq.f32.partialorder %v442_v4, 2139095040  ;;  %vm759_vm6 = vcmp.lt.f32.partialorder %v437_v2, 0  ;;  %vm241_vm13 = vcmp.lt.s32.totalorder %v439_v3, 0 }
  0x37   :  { %vm253_vm8 = vmor %vm553_vm4, %vm567_vm9  ;;  %272 = vpush %v59_v57  ;;  %v160_v60 = vsel %vm759_vm6, %v159_v54, %v522_v28  ;;  %vm255_vm4 = vcmp.eq.f32.partialorder %v439_v3, 3212836864  ;;  %vm762_vm9 = vcmp.eq.f32.partialorder %v469_v38, 2139095040  ;;  %vm263_vm6 = vcmp.ne.f32.partialorder %v439_v3, %v439_v3 }
  0x38   :  { %v254_v4 = vsel %vm253_vm8, 2139095040, %v417_v46  ;;  %vm240_vm8 = vcmp.eq.f32.partialorder %v439_v3, 1065353216  ;;  %v261_v11 = vsel %vm238_vm15, %v159_v54, %v522_v28  ;;  %385 = vrcp.f32 %v418_v20 }
  0x39   :  { %v256_v10 = vsel %vm255_vm4, 1065353216, %v254_v4 }
  0x3a   :  { %v382_v50 = vpop.eup %381 }
  0x3b   :  { %v144_v52 = vsel %vm531_vm12, 2143289344, %v382_v50  ;;  %vm119_vm12 = vcmp.eq.f32.partialorder %v466_v29, 0  ;;  %v384_v61 = vpop.eup %383 }
  0x3c   :  { %v146_v56 = vsel %vm138_vm11, %v145_v47, %v144_v52  ;;  %vm244_vm11 = vmand %vm238_vm15, %vm485_vm7 }
  0x3d   :  { %v148_v58 = vxor.u32 2147483648, %v146_v56  ;;  %vm622_vm7 = vmor %vm162_vm0, %vm163_vm1  ;;  %v245_v1 = vsel %vm244_vm11, 2143289344, %v384_v61  ;;  %vm120_vm11 = vcmp.eq.f32.partialorder %v466_v29, 1065353216 }
  0x3e   :  { %vm166_vm3 = vmor %vm139_vm2, %vm119_vm12  ;;  %vm243_vm2 = vcmp.eq.f32.partialorder %v445_v5, 2139095040  ;;  %v386_v21 = vpop.eup %385 }
  0x3f   :  { %v149_v62 = vsel %vm584_vm10, %v148_v58, %v146_v56  ;;  %vm763_vm10 = vcmp.eq.f32.partialorder %v439_v3, 0  ;;  %vm248_vm0 = vmand %vm241_vm13, %vm537_vm14  ;;  %v38_v22 = vmul.f32 256.0, %v386_v21  ;;  %vm42_vm15 = vweird.f32 %v386_v21 }
  0x40   :  { %v156_v0 = vsel %vm762_vm9, %v155_v59, %v149_v62  ;;  %v247_v7 = vsel %vm763_vm10, %v145_v47, %v245_v1  ;;  %vm265_vm14 = vmor %vm263_vm6, %vm163_vm1 }
  0x41   :  { %v161_v6 = vsel %vm142_vm5, %v160_v60, %v156_v0  ;;  %v249_v9 = vxor.u32 2147483648, %v247_v7  ;;  %vm764_vm5 = vmmov %vm762_vm9  ;;  %v39_v23 = vsub.f32 1.0, %v38_v22 }
  0x42   :  { %v165_v8 = vsel %vm622_vm7, 2143289344, %v161_v6  ;;  %vm267_vm13 = vmor %vm240_vm8, %vm119_vm12 }
  0x43   :  { %v167_v12 = vsel %vm166_vm3, 1065353216, %v165_v8  ;;  %v250_v14 = vsel %vm248_vm0, %v249_v9, %v247_v7  ;;  %v40_v24 = vmul.f32 %v386_v21, %v39_v23 }
  0x44   :  { %v257_v15 = vsel %vm764_vm5, %v256_v10, %v250_v14  ;;  %v168_v5 = vsel %vm120_vm11, %v437_v2, %v167_v12 }
  0x45   :  { %v262_v16 = vsel %vm243_vm2, %v261_v11, %v257_v15  ;;  %v41_v38 = vadd.f32 %v386_v21, %v40_v24 }
  0x46   :  { %v266_v13 = vsel %vm265_vm14, 2143289344, %v262_v16 }
  0x47   :  { %v268_v17 = vsel %vm267_vm13, 1065353216, %v266_v13  ;;  %v43_v25 = vsel %vm42_vm15, %v386_v21, %v41_v38 }
  0x48   :  { %v269_v18 = vsel %vm120_vm11, %v439_v3, %v268_v17 }
  0x49   :  { %v34_v19 = vadd.f32 %v269_v18, %v168_v5 }
  0x4b   :  { %35 = vadd.xlane.f32.xlu0 %v34_v19 }
  0x68   :  { %s273_s0 = spop %272 }
  0x69   :  { %v663_v45 = vstv %s273_s0 }
  0x6a   :  { %v666_v52 = vand.u32 2147483647, %v663_v45  ;;  %v327_v56 = vceil.f32 %v663_v45  ;;  %v328_v57 = vfloor.f32 %v663_v45  ;;  %vm326_vm12 = vcmp.lt.s32.totalorder %v663_v45, 0 }
  0x6b   :  { %vm325_vm11 = vcmp.lt.f32.partialorder %v663_v45, 0 }
  0x6c   :  { %v334_v59 = vfloor.f32 %v666_v52  ;;  %v329_v63 = vsel %vm326_vm12, %v327_v56, %v328_v57  ;;  %vm322_vm7 = vcmp.eq.f32.partialorder %v666_v52, 2139095040  ;;  %vm332_vm5 = vcmp.lt.f32.partialorder %v666_v52, 1266679808 }
  0x6d   :  { %vm330_vm4 = vcmp.ne.f32.partialorder %v663_v45, %v329_v63  ;;  %v361_v16 = vsel %vm325_vm11, 0, %v416_v27  ;;  %v349_v27 = vsel %vm325_vm11, 2139095040, %v417_v46 }
  0x6e   :  { %v335_v0 = vcvt.f32.s32 %v334_v59  ;;  %vm678_vm3 = vmor %vm330_vm4, %vm322_vm7  ;;  %v362_v13 = vxor.u32 2147483648, %v361_v16 }
  0x6f   :  { %vm338_vm2 = vmneg %vm678_vm3 }
  0x70   :  { %v336_v8 = vand.u32 1, %v335_v0 }
  0x72   :  { %vm337_vm8 = vcmp.eq.s32.totalorder %v336_v8, 1 }
  0x73   :  { %vm339_vm13 = vmand %vm337_vm8, %vm338_vm2  ;;  %vm367_vm8 = vcmp.ne.f32.partialorder %v663_v45, %v663_v45 }
  0x74   :  { %vm698_vm12 = vmand %vm332_vm5, %vm339_vm13 }
  0x75   :  { %v363_v21 = vsel %vm698_vm12, %v362_v13, %v361_v16 }
  0xbe   :  { %v36_v29 = vpop.xlane.xlu0 %35 }
  0xbf   :  { %v655_v26 = vmul.f32 %v43_v25, %v36_v29 }
  0xc1   :  { %v658_v2 = vand.u32 2147483647, %v655_v26  ;;  %vm342_vm15 = vcmp.eq.f32.partialorder %v655_v26, 0  ;;  %vm341_vm4 = vcmp.lt.f32.partialorder %v655_v26, 0  ;;  %vm358_vm2 = vcmp.eq.f32.partialorder %v655_v26, 3212836864 }
  0xc2   :  { %vm343_vm5 = vcmp.eq.f32.partialorder %v655_v26, 1065353216  ;;  %v364_v38 = vsel %vm341_vm4, %v363_v21, %v361_v16 }
  0xc3   :  { %v280_v28 = vand.u32 8388607, %v658_v2  ;;  %v276_v36 = vand.u32 2139095040, %v658_v2  ;;  %vm314_vm9 = vweird.f32 %v658_v2  ;;  %vm313_vm10 = vcmp.lt.f32.partialorder %v658_v2, 0.0 }
  0xc4   :  { %vm312_vm0 = vcmp.eq.f32.partialorder %v658_v2, 0.0  ;;  %vm311_vm6 = vcmp.eq.f32.partialorder %v658_v2, 1.0  ;;  %vm345_vm14 = vcmp.gt.f32.partialorder %v658_v2, 1065353216  ;;  %vm346_vm13 = vcmp.eq.f32.partialorder %v658_v2, 2139095040 }
  0xc5   :  { %v281_v3 = vor.u32 8388608, %v280_v28  ;;  %v277_v42 = vshrl.u32 %v276_v36, 23 }
  0xc7   :  { %v283_v30 = vand.u32 8388607, %v281_v3  ;;  %v373_v49 = vadd.s32 4294967169, %v277_v42 }
  0xc9   :  { %v284_v31 = vor.u32 1065353216, %v283_v30  ;;  %v288_v55 = vadd.s32 1, %v373_v49 }
  0xcb   :  { %vm285_vm1 = vcmp.ge.f32.partialorder %v284_v31, 1.4142135  ;;  %v286_v32 = vmul.f32 0.5, %v284_v31 }
  0xcc   :  { %v289_v62 = vsel %vm285_vm1, %v288_v55, %v373_v49 }
  0xcd   :  { %v287_v33 = vsel %vm285_vm1, %v286_v32, %v284_v31  ;;  %v309_v6 = vcvt.s32.f32 %v289_v62  ;;  %vm355_vm1 = vmxor %vm325_vm11, %vm345_vm14  ;;  %vm323_vm14 = vcmp.eq.f32.partialorder %v663_v45, 0 }
  0xce   :  { %v374_v34 = vadd.f32 -1.0, %v287_v33 }
  0xd0   :  { %v291_v35 = vmul.f32 %v374_v34, %v374_v34 }
  0xd2   :  { %v292_v37 = vmul.f32 0.12621109, %v291_v35  ;;  %v294_v39 = vmul.f32 -0.20706727, %v291_v35 }
  0xd4   :  { %v293_v40 = vadd.f32 0.21545328, %v292_v37  ;;  %v295_v41 = vadd.f32 -0.23896284, %v294_v39 }
  0xd6   :  { %v296_v43 = vmul.f32 %v293_v40, %v291_v35  ;;  %v298_v44 = vmul.f32 %v295_v41, %v291_v35 }
  0xd8   :  { %v297_v47 = vadd.f32 0.28795174, %v296_v43  ;;  %v299_v48 = vadd.f32 -0.3607037, %v298_v44 }
  0xda   :  { %v300_v50 = vmul.f32 %v297_v47, %v291_v35  ;;  %v302_v51 = vmul.f32 %v299_v48, %v291_v35 }
  0xdc   :  { %v301_v53 = vadd.f32 0.48090908, %v300_v50  ;;  %v303_v54 = vadd.f32 -0.72134733, %v302_v51 }
  0xde   :  { %v304_v58 = vmul.f32 %v301_v53, %v291_v35  ;;  %v306_v61 = vmul.f32 %v374_v34, %v303_v54 }
  0xe0   :  { %v305_v60 = vadd.f32 1.442695, %v304_v58 }
  0xe2   :  { %v307_v4 = vadd.f32 %v306_v61, %v305_v60 }
  0xe4   :  { %v308_v1 = vmul.f32 %v374_v34, %v307_v4 }
  0xe6   :  { %v310_v7 = vadd.f32 %v309_v6, %v308_v1 }
  0xe8   :  { %v315_v10 = vsel %vm314_vm9, %v658_v2, %v310_v7  ;;  %vm354_vm9 = vmand %vm325_vm11, %vm342_vm15  ;;  %vm366_vm11 = vcmp.ne.f32.partialorder %v655_v26, %v655_v26 }
  0xe9   :  { %v316_v11 = vsel %vm313_vm10, nan, %v315_v10  ;;  %vm356_vm10 = vmor %vm354_vm9, %vm355_vm1  ;;  %vm324_vm9 = vcmp.eq.f32.partialorder %v663_v45, 1065353216 }
  0xea   :  { %v317_v12 = vsel %vm312_vm0, -inf, %v316_v11  ;;  %vm347_vm0 = vmand %vm341_vm4, %vm678_vm3  ;;  %v357_v20 = vsel %vm356_vm10, 2139095040, %v417_v46 }
  0xeb   :  { %v318_v14 = vsel %vm311_vm6, 0.0, %v317_v12  ;;  %vm344_vm6 = vcmp.lt.s32.totalorder %v655_v26, 0  ;;  %v359_v23 = vsel %vm358_vm2, 1065353216, %v357_v20  ;;  %vm370_vm1 = vmor %vm343_vm5, %vm323_vm14 }
  0xec   :  { %v319_v15 = vmul.f32 %v318_v14, %v663_v45  ;;  %vm351_vm3 = vmand %vm344_vm6, %vm698_vm12  ;;  %vm63_vm12 = vcmask 7168  }
  0xee   :  { %387 = vpow2.f32 %v319_v15 }
  0xf4   :  { %v388_v17 = vpop.eup %387 }
  0xf5   :  { %v348_v18 = vsel %vm347_vm0, 2143289344, %v388_v17 }
  0xf6   :  { %v350_v19 = vsel %vm342_vm15, %v349_v27, %v348_v18  ;;  %vm368_vm15 = vmor %vm366_vm11, %vm367_vm8 }
  0xf7   :  { %v352_v22 = vxor.u32 2147483648, %v350_v19 }
  0xf9   :  { %v353_v46 = vsel %vm351_vm3, %v352_v22, %v350_v19 }
  0xfa   :  { %v360_v24 = vsel %vm322_vm7, %v359_v23, %v353_v46 }
  0xfb   :  { %v365_v25 = vsel %vm346_vm13, %v364_v38, %v360_v24 }
  0xfc   :  { %v369_v29 = vsel %vm368_vm15, 2143289344, %v365_v25 }
  0xfd   :  { %v371_v28 = vsel %vm370_vm1, 1065353216, %v369_v29 }
  0xfe   :  { %v372_v3 = vsel %vm324_vm9, %v655_v26, %v371_v28 }
  0xff   :  { %64 = vst.msk [vmem:[%s737_s2] sm:$0xff] %vm63_vm12, %v372_v3 }
 0x100   :  { %69 = vsyncpa [#allocation4], 1 }

</bundles_post_ra>
